<compile_context>
chip_gen: v7x
topology: tpu7x:2x2x1
jax: 0.10.0
libtpu: 0.0.40
codegen_flags: <defaults>
</compile_context>

<pallas_src>
import functools

import jax
import jax.numpy as jnp
from jax.experimental import pallas as pl
from jax.experimental.pallas import tpu as pltpu

NEG_SLOPE = 0.01  # nn.LeakyReLU() default


def _leaky_relu(v):
    return jnp.where(v > 0, v, NEG_SLOPE * v)


def gasto_mlp_kernel(x_ref, w1_ref, b1_ref, w2_ref, b2_ref, w3_ref, b3_ref, o_ref):
    """Fused MLP over one (tb, D) batch tile; writes a lane-dense (1, tb) row."""
    # Layer 1: (tb, D) @ (D, 64) on MXU, bf16 operands, f32 accumulate.
    x = x_ref[...]
    if x.dtype != jnp.bfloat16:
        x = x.astype(jnp.bfloat16)
    h1 = jnp.dot(x, w1_ref[...], preferred_element_type=jnp.float32) + b1_ref[...]
    h1 = _leaky_relu(h1)                                              # f32 (tb, 64)

    # Layer 2: (tb, 64) @ (64, 32).
    h2 = jnp.dot(h1.astype(jnp.bfloat16), w2_ref[...],
                 preferred_element_type=jnp.float32) + b2_ref[...]
    h2 = _leaky_relu(h2)                                              # f32 (tb, 32)

    # Layer 3 (out_features = 1): contract (1, 32) with (tb, 32) over the
    # feature dim -> (1, tb), already lane-dense for the store.
    # TODO(synk): per review, double-check via pl.lower_as_mlir that this
    # trans-RHS contraction does not insert a per-step XLU relayout of h2.
    out = jax.lax.dot_general(
        w3_ref[...], h2.astype(jnp.bfloat16),
        dimension_numbers=(((1,), (1,)), ((), ())),
        preferred_element_type=jnp.float32)                           # (1, tb)
    o_ref[...] = (out + b3_ref[0, 0]).astype(o_ref.dtype)


def _choose_tile(B, tb=None):
    """Batch-tile heuristic: big tiles, but keep >=4 grid steps when B allows."""
    if tb is not None:
        assert tb % 128 == 0, "batch tile must be a multiple of 128 (lane width)"
        return tb
    target = -(-B // 4)                       # aim for ~4 grid steps
    tb = ((target + 127) // 128) * 128        # round up to lane width
    return max(128, min(4096, tb))            # cap for v7x VMEM / v5e scoped VMEM


def gasto_nn_forward(x, params, *, tb=None):
    """x: (B, input_size) float32 or bfloat16. Returns (B, 1) float32."""
    w1, b1, w2, b2, w3, b3 = params
    B, D = x.shape
    tb = _choose_tile(B, tb)
    num_tiles = pl.cdiv(B, tb)
    total = num_tiles * tb

    # bf16 MXU operands (weights are tiny and stay resident in VMEM).
    w1b = w1.astype(jnp.bfloat16)                  # (D, 64)
    w2b = w2.astype(jnp.bfloat16)                  # (64, 32)
    w3b = w3.reshape(1, -1).astype(jnp.bfloat16)   # (1, 32) row form of fc3 weight
    b1f = b1.astype(jnp.float32)                   # (1, 64)
    b2f = b2.astype(jnp.float32)                   # (1, 32)
    b3s = b3.reshape(1, 1).astype(jnp.float32)     # scalar, lives in SMEM

    out_row = pl.pallas_call(
        gasto_mlp_kernel,
        out_shape=jax.ShapeDtypeStruct((1, total), jnp.float32),
        grid_spec=pltpu.PrefetchScalarGridSpec(
            num_scalar_prefetch=0,
            grid=(num_tiles,),
            in_specs=[
                # x tile over the batch; tail block may be partial (ragged B),
                # its undefined rows are discarded by the [:B] slice below.
                pl.BlockSpec((tb, D), lambda i: (i, 0)),
                pl.BlockSpec(w1b.shape, lambda i: (0, 0)),      # resident weights
                pl.BlockSpec(b1f.shape, lambda i: (0, 0)),
                pl.BlockSpec(w2b.shape, lambda i: (0, 0)),
                pl.BlockSpec(b2f.shape, lambda i: (0, 0)),
                pl.BlockSpec(w3b.shape, lambda i: (0, 0)),
                pl.BlockSpec(memory_space=pltpu.MemorySpace.SMEM),  # b3 scalar
            ],
            out_specs=pl.BlockSpec((1, tb), lambda i: (0, i)),  # lane-dense row
        ),
        compiler_params=pltpu.CompilerParams(
            dimension_semantics=("parallel",),
            vmem_limit_bytes=48 * 1024 * 1024),
    )(x, w1b, b1f, w2b, b2f, w3b, b3s)

    # (1, num_tiles*tb) is batch order along lanes; drop the ragged tail,
    # restore the PyTorch (B, 1) shape.
    return out_row.reshape(total, 1)[:B]


def init_params(key, input_size):
    """Deterministic init mirroring nn.Linear shapes.

    PyTorch stores W as (out, in); we keep them pre-transposed (in, out) so the
    kernel computes y = x @ W + b (same math as y = x @ W.T + b in PyTorch).
    Master params are f32; bf16 casting happens at the kernel boundary.
    """
    k1, k2, k3, k4, k5, k6 = jax.random.split(key, 6)
    scale = 0.1
    w1 = scale * jax.random.normal(k1, (input_size, 64), jnp.float32)
    b1 = scale * jax.random.normal(k2, (1, 64), jnp.float32)
    w2 = scale * jax.random.normal(k3, (64, 32), jnp.float32)
    b2 = scale * jax.random.normal(k4, (1, 32), jnp.float32)
    w3 = scale * jax.random.normal(k5, (32, 1), jnp.float32)
    b3 = scale * jax.random.normal(k6, (1, 1), jnp.float32)
    return (w1, b1, w2, b2, w3, b3)


def reference_forward(x, params):
    w1, b1, w2, b2, w3, b3 = params
    h = jax.nn.leaky_relu(x @ w1 + b1, NEG_SLOPE)
    h = jax.nn.leaky_relu(h @ w2 + b2, NEG_SLOPE)
    return h @ w3 + b3


if __name__ == "__main__":
    key = jax.random.PRNGKey(0)
    kx, kp = jax.random.split(key)

    # Ragged batch (B % 128 != 0) exercises the partial tail block; the
    # adaptive tile picks tb=256 -> 4 grid steps, so both v7x TCs get work.
    B, INPUT_SIZE = 1000, 16
    x = jax.random.normal(kx, (B, INPUT_SIZE), jnp.float32)
    params = init_params(kp, INPUT_SIZE)

    fwd = jax.jit(functools.partial(gasto_nn_forward))
    out = jax.block_until_ready(fwd(x, params))

    ref = reference_forward(x, params)
    assert out.shape == (B, 1), out.shape
    # Tolerance loosened for bf16 MXU operands (f32 accumulation).
    assert jnp.allclose(out, ref, atol=3e-2, rtol=3e-2), "mismatch vs reference"

    print("KERNEL_OK")
</pallas_src>

<mosaic_0001>
module attributes {stable_mosaic.version = 11 : i64} {
  func.func @gasto_mlp_kernel(%arg0: i32, %arg1: memref<256x16xf32, #tpu.memory_space<vmem>>, %arg2: memref<16x64xbf16, #tpu.memory_space<vmem>>, %arg3: memref<1x64xf32, #tpu.memory_space<vmem>>, %arg4: memref<64x32xbf16, #tpu.memory_space<vmem>>, %arg5: memref<1x32xf32, #tpu.memory_space<vmem>>, %arg6: memref<1x32xbf16, #tpu.memory_space<vmem>>, %arg7: memref<1x1xf32, #tpu.memory_space<smem>>, %arg8: memref<1x256xf32, #tpu.memory_space<vmem>>) attributes {dimension_semantics = [#tpu.dimension_semantics<parallel>], iteration_bounds = array<i64: 4>, scalar_prefetch = 0 : i64, scratch_operands = 0 : i64, tpu.core_type = #tpu.core_type<tc>, window_params = [{transform_indices = @transform_0, window_bounds = array<i64: 256, 16>}, {pipeline_mode = #tpu.pipeline_mode<synchronous>, transform_indices = @transform_1, window_bounds = array<i64: 16, 64>}, {pipeline_mode = #tpu.pipeline_mode<synchronous>, transform_indices = @transform_2, window_bounds = array<i64: 1, 64>}, {pipeline_mode = #tpu.pipeline_mode<synchronous>, transform_indices = @transform_3, window_bounds = array<i64: 64, 32>}, {pipeline_mode = #tpu.pipeline_mode<synchronous>, transform_indices = @transform_4, window_bounds = array<i64: 1, 32>}, {pipeline_mode = #tpu.pipeline_mode<synchronous>, transform_indices = @transform_5, window_bounds = array<i64: 1, 32>}, {transform_indices = @transform_6, window_bounds = array<i64: 1, 1>}, {transform_indices = @transform_7, window_bounds = array<i64: 1, 256>}]} {
    %c0 = arith.constant 0 : index
    %c0_0 = arith.constant 0 : index
    %0 = vector.load %arg1[%c0, %c0_0] : memref<256x16xf32, #tpu.memory_space<vmem>>, vector<256x16xf32>
    %1 = arith.truncf %0 : vector<256x16xf32> to vector<256x16xbf16>
    %c0_1 = arith.constant 0 : index
    %c0_2 = arith.constant 0 : index
    %2 = vector.load %arg2[%c0_1, %c0_2] : memref<16x64xbf16, #tpu.memory_space<vmem>>, vector<16x64xbf16>
    %cst = arith.constant dense<0.000000e+00> : vector<256x64xf32>
    %3 = tpu.matmul %1, %2, %cst {dimension_numbers = #tpu.dot_dimension_numbers<[1], [0], [0], [1], [0, 0, 1, 1], [], []>} : vector<256x16xbf16>, vector<16x64xbf16>, vector<256x64xf32> -> vector<256x64xf32>
    %c0_3 = arith.constant 0 : index
    %c0_4 = arith.constant 0 : index
    %4 = vector.load %arg3[%c0_3, %c0_4] : memref<1x64xf32, #tpu.memory_space<vmem>>, vector<1x64xf32>
    %5 = vector.broadcast %4 : vector<1x64xf32> to vector<256x64xf32>
    %6 = arith.addf %3, %5 : vector<256x64xf32>
    %cst_5 = arith.constant 0.000000e+00 : f32
    %7 = vector.broadcast %cst_5 : f32 to vector<256x64xf32>
    %8 = arith.cmpf ogt, %6, %7 : vector<256x64xf32>
    %cst_6 = arith.constant 0.00999999977 : f32
    %9 = vector.broadcast %cst_6 : f32 to vector<256x64xf32>
    %10 = arith.mulf %9, %6 : vector<256x64xf32>
    %11 = arith.select %8, %6, %10 : vector<256x64xi1>, vector<256x64xf32>
    %12 = arith.truncf %11 : vector<256x64xf32> to vector<256x64xbf16>
    %c0_7 = arith.constant 0 : index
    %c0_8 = arith.constant 0 : index
    %13 = vector.load %arg4[%c0_7, %c0_8] : memref<64x32xbf16, #tpu.memory_space<vmem>>, vector<64x32xbf16>
    %cst_9 = arith.constant dense<0.000000e+00> : vector<256x32xf32>
    %14 = tpu.matmul %12, %13, %cst_9 {dimension_numbers = #tpu.dot_dimension_numbers<[1], [0], [0], [1], [0, 0, 1, 1], [], []>} : vector<256x64xbf16>, vector<64x32xbf16>, vector<256x32xf32> -> vector<256x32xf32>
    %c0_10 = arith.constant 0 : index
    %c0_11 = arith.constant 0 : index
    %15 = vector.load %arg5[%c0_10, %c0_11] : memref<1x32xf32, #tpu.memory_space<vmem>>, vector<1x32xf32>
    %16 = vector.broadcast %15 : vector<1x32xf32> to vector<256x32xf32>
    %17 = arith.addf %14, %16 : vector<256x32xf32>
    %cst_12 = arith.constant 0.000000e+00 : f32
    %18 = vector.broadcast %cst_12 : f32 to vector<256x32xf32>
    %19 = arith.cmpf ogt, %17, %18 : vector<256x32xf32>
    %cst_13 = arith.constant 0.00999999977 : f32
    %20 = vector.broadcast %cst_13 : f32 to vector<256x32xf32>
    %21 = arith.mulf %20, %17 : vector<256x32xf32>
    %22 = arith.select %19, %17, %21 : vector<256x32xi1>, vector<256x32xf32>
    %c0_14 = arith.constant 0 : index
    %c0_15 = arith.constant 0 : index
    %23 = vector.load %arg6[%c0_14, %c0_15] : memref<1x32xbf16, #tpu.memory_space<vmem>>, vector<1x32xbf16>
    %24 = arith.truncf %22 : vector<256x32xf32> to vector<256x32xbf16>
    %cst_16 = arith.constant dense<0.000000e+00> : vector<1x256xf32>
    %25 = tpu.matmul %23, %24, %cst_16 {dimension_numbers = #tpu.dot_dimension_numbers<[1], [1], [0], [0], [0, 0, 1, 0], [], []>} : vector<1x32xbf16>, vector<256x32xbf16>, vector<1x256xf32> -> vector<1x256xf32>
    %c0_17 = arith.constant 0 : index
    %c0_18 = arith.constant 0 : index
    %26 = memref.load %arg7[%c0_17, %c0_18] : memref<1x1xf32, #tpu.memory_space<smem>>
    %27 = vector.broadcast %26 : f32 to vector<1x256xf32>
    %28 = arith.addf %25, %27 : vector<1x256xf32>
    %c0_19 = arith.constant 0 : index
    %c0_20 = arith.constant 0 : index
    %29 = vector.load %arg8[%c0_19, %c0_20] : memref<1x256xf32, #tpu.memory_space<vmem>>, vector<1x256xf32>
    tpu.vector_store %arg8[%c0_19, %c0_20], %28 {strides = array<i32>} : memref<1x256xf32, #tpu.memory_space<vmem>>, vector<1x256xf32>,
    return
  }
  func.func @transform_0(%arg0: i32) -> (i32, i32) {
    %c0_i32 = arith.constant 0 : i32
    %c0_i32_0 = arith.constant 0 : i32
    return %arg0, %c0_i32 : i32, i32
  }
  func.func @transform_1(%arg0: i32) -> (i32, i32) {
    %c0_i32 = arith.constant 0 : i32
    %c0_i32_0 = arith.constant 0 : i32
    %c0_i32_1 = arith.constant 0 : i32
    return %c0_i32, %c0_i32_0 : i32, i32
  }
  func.func @transform_2(%arg0: i32) -> (i32, i32) {
    %c0_i32 = arith.constant 0 : i32
    %c0_i32_0 = arith.constant 0 : i32
    %c0_i32_1 = arith.constant 0 : i32
    return %c0_i32, %c0_i32_0 : i32, i32
  }
  func.func @transform_3(%arg0: i32) -> (i32, i32) {
    %c0_i32 = arith.constant 0 : i32
    %c0_i32_0 = arith.constant 0 : i32
    %c0_i32_1 = arith.constant 0 : i32
    return %c0_i32, %c0_i32_0 : i32, i32
  }
  func.func @transform_4(%arg0: i32) -> (i32, i32) {
    %c0_i32 = arith.constant 0 : i32
    %c0_i32_0 = arith.constant 0 : i32
    %c0_i32_1 = arith.constant 0 : i32
    return %c0_i32, %c0_i32_0 : i32, i32
  }
  func.func @transform_5(%arg0: i32) -> (i32, i32) {
    %c0_i32 = arith.constant 0 : i32
    %c0_i32_0 = arith.constant 0 : i32
    %c0_i32_1 = arith.constant 0 : i32
    return %c0_i32, %c0_i32_0 : i32, i32
  }
  func.func @transform_6(%arg0: i32) -> (i32, i32) {
    %c0_i32 = arith.constant 0 : i32
    %c0_i32_0 = arith.constant 0 : i32
    %c0_i32_1 = arith.constant 0 : i32
    return %c0_i32, %c0_i32_0 : i32, i32
  }
  func.func @transform_7(%arg0: i32) -> (i32, i32) {
    %c0_i32 = arith.constant 0 : i32
    %c0_i32_0 = arith.constant 0 : i32
    return %c0_i32, %arg0 : i32, i32
  }
}

</mosaic_0001>

<bundles_post_ra>
// kernel: gasto_nn_forward.1
= control target key start
LH: loop header
LB: loop body
LE: loop exit
PB: predicated region body
PF: predicated region fallthrough
CT: control target
= control target key end

     0   :  { %s1470_s26 = smov 0   ;;  %s1743_s0 = inlined_call_operand.vmem [shape: f32[1000,16], index: 0, kind: input, shape index: {}]   ;;  %s1744_s1 = inlined_call_operand.vmem [shape: bf16[16,64], index: 1, kind: input, shape index: {}]   ;;  %s1745_s2 = inlined_call_operand.vmem [shape: f32[1,64], index: 2, kind: input, shape index: {}]   ;;  %s1746_s3 = inlined_call_operand.vmem [shape: bf16[64,32], index: 3, kind: input, shape index: {}]   ;;  %s1747_s4 = inlined_call_operand.vmem [shape: f32[1,32], index: 4, kind: input, shape index: {}]   ;;  %s1748_s5 = inlined_call_operand.vmem [shape: bf16[1,32], index: 5, kind: input, shape index: {}]   ;;  %s1749_s6 = inlined_call_operand.<no memory space> [shape: f32[1,1], index: 6, kind: input, shape index: {}]   ;;  %s1750_s7 = inlined_call_operand.vmem [shape: f32[1,1024], index: 7, kind: output, shape index: {}]  }
   0x1   :  { %12 = sst [smem:[#allocation2]] %s1749_s6 }
   0x2 LB: > { %s1217_s27 = sadd.s32 4294967295, %s1424_s26   ;;  %p1221_p0 = scmp.ge.s32.totalorder %s1424_s26, 1  ;;  %s1424_s26 = sphi %s1470_s26, %s18_s26  }
   0x3   : > { %p247_p1 = scmp.lt.s32.totalorder %s1424_s26, 5 }
   0x5   : > { %p248_p2 = pnand %p1221_p0, %p247_p1 }
   0x6   : > { %v1413_v0 = vld [vmem:[%s1744_s1] sm:$0xff] (!%p248_p2)   ;;  %s1222_s6 = sshll.u32 (!%p248_p2), %s1217_s27, 5  ;;  %vm365_vm0 = vcmask (!%p248_p2), 130048   ;;  %v1415_v50 = vld [vmem:[%s1746_s3 + $0x8] sm:$0xff] (!%p248_p2)   ;;  %v1416_v51 = vld [vmem:[%s1746_s3 + $0x10] sm:$0xff] (!%p248_p2)   ;;  %vm726_vm5 = vcmask (!%p248_p2), 523264  }
   0x7   : > { %251 = sbr.rel (%p248_p2) target bundleno = 784 (0x310), region = 48  ;;  %p287_p3 = scmp.lt.s32.totalorder (!%p248_p2), %s1222_s6, 124  ;;  %1322 = vmatprep.subr.bf16.mxu0 (!%p248_p2), %v1413_v0  ;;  %v1414_v1 = vld [vmem:[%s1746_s3] sm:$0xff] (!%p248_p2)   ;;  %v1417_v52 = vld [vmem:[%s1746_s3 + $0x18] sm:$0xff] (!%p248_p2)  }
   0x8   : > { %1323 = vmatpush3.bf16.msra.mxu0 (!%p248_p2), %v1413_v0  ;;  %1356 = vmatprep.subr.bf16.mxu1 (!%p248_p2), %v1414_v1  ;;  %v1551_v53 = vld [vmem:[%s1745_s2] ss:$0 sm:$0xff] (!%p248_p2)  ;;  %s1049_s25 = sld [smem:[#allocation2]] (!%p248_p2)  ;;  %s1224_s28 = sshll.u32 (!%p248_p2), %s1217_s27, 1 }
   0x9   : > { %1357 = vmatpush3.bf16.msra.mxu1 (!%p248_p2), %v1414_v1  ;;  %p297_p4 = scmp.lt.s32.totalorder (!%p248_p2), %s1224_s28, 7 }
   0xa   : > { %1358 = vmatprep.subr.bf16.mxu1 (!%p248_p2), %v1415_v50 }
   0xd   : > { %1359 = vmatpush3.bf16.msra.mxu1 (!%p248_p2), %v1415_v50 }
   0xe   : > { %s1752_s6 = smov (!%p287_p3, %s1222_s6), 124  ;;  %1360 = vmatprep.subr.bf16.mxu1 %v1416_v51  ;;  %s1754_s28 = smov (!%p297_p4, %s1224_s28), 7 }
   0xf   : > { %s1223_s9 = sshll.u32 %s1752_s6, 3  ;;  %s299_s30 = scalar_lea.vmem %s1750_s7, %s1754_s28 }
  0x10   : > { %s1489_s12 = scalar_lea.vmem %s1743_s0, %s1223_s9 }
  0x11   : > { %v302_v2 = vld [vmem:[%s1489_s12] sm:$0xff]  ;;  %v303_v3 = vld [vmem:[%s1489_s12 + $0x8] sm:$0xff]  ;;  %v304_v4 = vld [vmem:[%s1489_s12 + $0x10] sm:$0xff]  ;;  %1361 = vmatpush3.bf16.msra.mxu1 %v1416_v51 }
  0x12   : > { %v334_v5 = vpack.c.bf16 %v303_v3, %v302_v2  ;;  %v305_v6 = vld [vmem:[%s1489_s12 + $0x18] sm:$0xff]  ;;  %v306_v7 = vld [vmem:[%s1489_s12 + $0x20] sm:$0xff]  ;;  %v307_v8 = vld [vmem:[%s1489_s12 + $0x28] sm:$0xff]  ;;  %1362 = vmatprep.subr.bf16.mxu1 %v1417_v52 }
  0x13   : > { %v335_v9 = vpack.c.bf16 %v305_v6, %v304_v4  ;;  %v336_v10 = vpack.c.bf16 %v307_v8, %v306_v7  ;;  %v308_v11 = vld [vmem:[%s1489_s12 + $0x30] sm:$0xff]  ;;  %v309_v12 = vld [vmem:[%s1489_s12 + $0x38] sm:$0xff]  ;;  %v310_v13 = vld [vmem:[%s1489_s12 + $0x40] sm:$0xff] }
  0x14   : > { %1324 = vmatprep.mubr.msk.bf16.mxu0 %vm365_vm0, %v334_v5  ;;  %v311_v14 = vld [vmem:[%s1489_s12 + $0x48] sm:$0xff]  ;;  %v337_v15 = vpack.c.bf16 %v309_v12, %v308_v11  ;;  %v312_v17 = vld [vmem:[%s1489_s12 + $0x50] sm:$0xff]  ;;  %v313_v18 = vld [vmem:[%s1489_s12 + $0x58] sm:$0xff] }
  0x15   : > { %1325 = vmatmul.mubr.msk.bf16.vlgmr.msra.gmra.mrb[0].mxu0 %vm365_vm0, %v335_v9  ;;  %v338_v16 = vpack.c.bf16 %v311_v14, %v310_v13  ;;  %v314_v19 = vld [vmem:[%s1489_s12 + $0x60] sm:$0xff]  ;;  %v315_v20 = vld [vmem:[%s1489_s12 + $0x68] sm:$0xff]  ;;  %v339_v21 = vpack.c.bf16 %v313_v18, %v312_v17  ;;  %v316_v23 = vld [vmem:[%s1489_s12 + $0x70] sm:$0xff]  ;;  %1363 = vmatpush3.bf16.msra.mxu1 %v1417_v52 }
  0x16   : > { %1328 = vmatprep.mubr.msk.bf16.mxu0 %vm365_vm0, %v336_v10  ;;  %v340_v22 = vpack.c.bf16 %v315_v20, %v314_v19  ;;  %v317_v24 = vld [vmem:[%s1489_s12 + $0x78] sm:$0xff]  ;;  %v318_v25 = vld [vmem:[%s1489_s12 + $0x80] sm:$0xff]  ;;  %v319_v26 = vld [vmem:[%s1489_s12 + $0x88] sm:$0xff] }
  0x17   : > { %v341_v27 = vpack.c.bf16 %v317_v24, %v316_v23  ;;  %v342_v28 = vpack.c.bf16 %v319_v26, %v318_v25  ;;  %v320_v29 = vld [vmem:[%s1489_s12 + $0x90] sm:$0xff]  ;;  %v321_v30 = vld [vmem:[%s1489_s12 + $0x98] sm:$0xff]  ;;  %v322_v31 = vld [vmem:[%s1489_s12 + $0xa0] sm:$0xff] }
  0x18   : > { %v323_v32 = vld [vmem:[%s1489_s12 + $0xa8] sm:$0xff]  ;;  %v343_v33 = vpack.c.bf16 %v321_v30, %v320_v29  ;;  %v324_v35 = vld [vmem:[%s1489_s12 + $0xb0] sm:$0xff]  ;;  %v325_v36 = vld [vmem:[%s1489_s12 + $0xb8] sm:$0xff] }
  0x19   : > { %v344_v34 = vpack.c.bf16 %v323_v32, %v322_v31  ;;  %v326_v37 = vld [vmem:[%s1489_s12 + $0xc0] sm:$0xff]  ;;  %v327_v38 = vld [vmem:[%s1489_s12 + $0xc8] sm:$0xff]  ;;  %v345_v39 = vpack.c.bf16 %v325_v36, %v324_v35  ;;  %v328_v41 = vld [vmem:[%s1489_s12 + $0xd0] sm:$0xff] }
  0x1a   : > { %v346_v40 = vpack.c.bf16 %v327_v38, %v326_v37  ;;  %v329_v42 = vld [vmem:[%s1489_s12 + $0xd8] sm:$0xff]  ;;  %v330_v43 = vld [vmem:[%s1489_s12 + $0xe0] sm:$0xff]  ;;  %v331_v44 = vld [vmem:[%s1489_s12 + $0xe8] sm:$0xff] }
  0x1b   : > { %v347_v45 = vpack.c.bf16 %v329_v42, %v328_v41  ;;  %v348_v46 = vpack.c.bf16 %v331_v44, %v330_v43  ;;  %v332_v47 = vld [vmem:[%s1489_s12 + $0xf0] sm:$0xff]  ;;  %v333_v48 = vld [vmem:[%s1489_s12 + $0xf8] sm:$0xff] }
  0x1c   : > { %v349_v49 = vpack.c.bf16 %v333_v48, %v332_v47 }
  0x1d   : > { %1329 = vmatmul.mubr.msk.bf16.gmra.mrb[4].mxu0 %vm365_vm0, %v337_v15 }
  0x1e   : > { %1332 = vmatprep.mubr.msk.bf16.mxu0 %vm365_vm0, %v338_v16 }
  0x25   : > { %1333 = vmatmul.mubr.msk.bf16.gmra.mrb[8].mxu0 %vm365_vm0, %v339_v21 }
  0x26   : > { %1336 = vmatprep.mubr.msk.bf16.mxu0 %vm365_vm0, %v340_v22 }
  0x2d   : > { %1337 = vmatmul.mubr.msk.bf16.gmra.mrb[12].mxu0 %vm365_vm0, %v341_v27 }
  0x2e   : > { %1340 = vmatprep.mubr.msk.bf16.mxu0 %vm365_vm0, %v342_v28 }
  0x35   : > { %1341 = vmatmul.mubr.msk.bf16.gmra.mrb[16].mxu0 %vm365_vm0, %v343_v33 }
  0x36   : > { %1344 = vmatprep.mubr.msk.bf16.mxu0 %vm365_vm0, %v344_v34 }
  0x3d   : > { %1345 = vmatmul.mubr.msk.bf16.gmra.mrb[20].mxu0 %vm365_vm0, %v345_v39 }
  0x3e   : > { %1348 = vmatprep.mubr.msk.bf16.mxu0 %vm365_vm0, %v346_v40 }
  0x45   : > { %1349 = vmatmul.mubr.msk.bf16.gmra.mrb[24].mxu0 %vm365_vm0, %v347_v45 }
  0x46   : > { %1352 = vmatprep.mubr.msk.bf16.mxu0 %vm365_vm0, %v348_v46 }
  0x4d   : > { %1353 = vmatmul.mubr.msk.bf16.gmra.mrb[28].mxu0 %vm365_vm0, %v349_v49 }
  0xe8   : > { %v1326_v54 = vpop.f32.mrb[0].mxu0 }
  0xe9   : > { %v457_v55 = vadd.f32 %v1326_v54, %v1551_v53  ;;  %v448_v56 = vpop.f32.mrb[1].mxu0 }
  0xea   : > { %v449_v57 = vadd.f32 %v1551_v53, %v448_v56  ;;  %v1327_v58 = vpop.f32.mrb[2].mxu0 }
  0xeb   : > { %v609_v59 = vmul.f32 0.01, %v457_v55  ;;  %v460_v60 = vadd.f32 %v1327_v58, %v1551_v53  ;;  %v451_v61 = vpop.f32.mrb[3].mxu0  ;;  %vm577_vm1 = vcmp.gt.f32.partialorder %v457_v55, 0.0 }
  0xec   : > { %v607_v62 = vmul.f32 0.01, %v449_v57  ;;  %v452_v63 = vadd.f32 %v1551_v53, %v451_v61  ;;  %vm575_vm3 = vcmp.gt.f32.partialorder %v449_v57, 0.0 }
  0xed   : > { %vm578_vm2 = vcmp.gt.f32.partialorder %v460_v60, 0.0  ;;  %v610_v0 = vmul.f32 0.01, %v460_v60  ;;  %v641_v2 = vsel %vm577_vm1, %v457_v55, %v609_v59 }
  0xee   : > { %v608_v1 = vmul.f32 0.01, %v452_v63  ;;  %vm576_vm4 = vcmp.gt.f32.partialorder %v452_v63, 0.0  ;;  %v639_v6 = vsel %vm575_vm3, %v449_v57, %v607_v62 }
  0xef   : > { %v642_v3 = vsel %vm578_vm2, %v460_v60, %v610_v0 }
  0xf0   : > { %v672_v4 = vpack.c.bf16 %v642_v3, %v641_v2  ;;  %v1330_v5 = vpop.f32.mrb[4].mxu0  ;;  %v640_v7 = vsel %vm576_vm4, %v452_v63, %v608_v1 }
  0xf1   : > { %v473_v8 = vadd.f32 %v1330_v5, %v1551_v53  ;;  %v464_v9 = vpop.f32.mrb[5].mxu0  ;;  %v671_v10 = vpack.c.bf16 %v640_v7, %v639_v6 }
  0xf2   : > { %v465_v11 = vadd.f32 %v1551_v53, %v464_v9  ;;  %v1331_v12 = vpop.f32.mrb[6].mxu0 }
  0xf3   : > { %v613_v13 = vmul.f32 0.01, %v473_v8  ;;  %v476_v14 = vadd.f32 %v1331_v12, %v1551_v53  ;;  %v467_v15 = vpop.f32.mrb[7].mxu0  ;;  %1364 = vmatprep.mubr.msk.bf16.mxu1 %vm726_vm5, %v671_v10  ;;  %vm581_vm6 = vcmp.gt.f32.partialorder %v473_v8, 0.0 }
  0xf4   : > { %v611_v16 = vmul.f32 0.01, %v465_v11  ;;  %v468_v17 = vadd.f32 %v1551_v53, %v467_v15  ;;  %1365 = vmatmul.mubr.msk.bf16.vlgmr.msra.gmra.mrb[0].mxu1 %vm726_vm5, %v672_v4  ;;  %vm579_vm7 = vcmp.gt.f32.partialorder %v465_v11, 0.0 }
  0xf5   : > { %vm582_vm8 = vcmp.gt.f32.partialorder %v476_v14, 0.0  ;;  %v614_v18 = vmul.f32 0.01, %v476_v14  ;;  %v645_v20 = vsel %vm581_vm6, %v473_v8, %v613_v13 }
  0xf6   : > { %vm580_vm9 = vcmp.gt.f32.partialorder %v468_v17, 0.0  ;;  %v612_v19 = vmul.f32 0.01, %v468_v17  ;;  %v643_v22 = vsel %vm579_vm7, %v465_v11, %v611_v16 }
  0xf7   : > { %v646_v21 = vsel %vm582_vm8, %v476_v14, %v614_v18 }
  0xf8   : > { %v674_v23 = vpack.c.bf16 %v646_v21, %v645_v20  ;;  %v644_v24 = vsel %vm580_vm9, %v468_v17, %v612_v19  ;;  %v1334_v25 = vpop.f32.mrb[8].mxu0 }
  0xf9   : > { %v673_v26 = vpack.c.bf16 %v644_v24, %v643_v22  ;;  %v489_v27 = vadd.f32 %v1334_v25, %v1551_v53  ;;  %v480_v28 = vpop.f32.mrb[9].mxu0 }
  0xfa   : > { %v481_v29 = vadd.f32 %v1551_v53, %v480_v28  ;;  %v1335_v30 = vpop.f32.mrb[10].mxu0 }
  0xfb   : > { %v617_v31 = vmul.f32 0.01, %v489_v27  ;;  %v492_v32 = vadd.f32 %v1335_v30, %v1551_v53  ;;  %v483_v33 = vpop.f32.mrb[11].mxu0  ;;  %1368 = vmatprep.mubr.msk.bf16.mxu1 %vm726_vm5, %v673_v26  ;;  %vm585_vm10 = vcmp.gt.f32.partialorder %v489_v27, 0.0 }
  0xfc   : > { %v615_v34 = vmul.f32 0.01, %v481_v29  ;;  %v484_v35 = vadd.f32 %v1551_v53, %v483_v33  ;;  %1369 = vmatmul.mubr.msk.bf16.gmra.mrb[4].mxu1 %vm726_vm5, %v674_v23  ;;  %vm583_vm11 = vcmp.gt.f32.partialorder %v481_v29, 0.0 }
  0xfd   : > { %vm586_vm12 = vcmp.gt.f32.partialorder %v492_v32, 0.0  ;;  %v618_v36 = vmul.f32 0.01, %v492_v32  ;;  %v649_v38 = vsel %vm585_vm10, %v489_v27, %v617_v31 }
  0xfe   : > { %vm584_vm13 = vcmp.gt.f32.partialorder %v484_v35, 0.0  ;;  %v616_v37 = vmul.f32 0.01, %v484_v35  ;;  %v647_v40 = vsel %vm583_vm11, %v481_v29, %v615_v34 }
  0xff   : > { %v650_v39 = vsel %vm586_vm12, %v492_v32, %v618_v36 }
 0x100   : > { %v676_v41 = vpack.c.bf16 %v650_v39, %v649_v38  ;;  %v648_v42 = vsel %vm584_vm13, %v484_v35, %v616_v37  ;;  %v1338_v43 = vpop.f32.mrb[12].mxu0 }
 0x101   : > { %v675_v44 = vpack.c.bf16 %v648_v42, %v647_v40  ;;  %v505_v45 = vadd.f32 %v1338_v43, %v1551_v53  ;;  %v496_v46 = vpop.f32.mrb[13].mxu0 }
 0x102   : > { %v497_v47 = vadd.f32 %v1551_v53, %v496_v46  ;;  %v1339_v48 = vpop.f32.mrb[14].mxu0 }
 0x103   : > { %v621_v49 = vmul.f32 0.01, %v505_v45  ;;  %v508_v50 = vadd.f32 %v1339_v48, %v1551_v53  ;;  %v499_v51 = vpop.f32.mrb[15].mxu0  ;;  %1372 = vmatprep.mubr.msk.bf16.mxu1 %vm726_vm5, %v675_v44  ;;  %vm589_vm14 = vcmp.gt.f32.partialorder %v505_v45, 0.0 }
 0x104   : > { %v619_v52 = vmul.f32 0.01, %v497_v47  ;;  %v500_v54 = vadd.f32 %v1551_v53, %v499_v51  ;;  %1373 = vmatmul.mubr.msk.bf16.gmra.mrb[8].mxu1 %vm726_vm5, %v676_v41  ;;  %vm587_vm15 = vcmp.gt.f32.partialorder %v497_v47, 0.0 }
 0x105   : > { %vm590_vm0 = vcmp.gt.f32.partialorder %v508_v50, 0.0  ;;  %v622_v55 = vmul.f32 0.01, %v508_v50  ;;  %v653_v57 = vsel %vm589_vm14, %v505_v45, %v621_v49 }
 0x106   : > { %vm588_vm1 = vcmp.gt.f32.partialorder %v500_v54, 0.0  ;;  %v620_v56 = vmul.f32 0.01, %v500_v54  ;;  %v651_v59 = vsel %vm587_vm15, %v497_v47, %v619_v52 }
 0x107   : > { %v654_v58 = vsel %vm590_vm0, %v508_v50, %v622_v55 }
 0x108   : > { %v678_v60 = vpack.c.bf16 %v654_v58, %v653_v57  ;;  %v652_v61 = vsel %vm588_vm1, %v500_v54, %v620_v56  ;;  %v1342_v62 = vpop.f32.mrb[16].mxu0 }
 0x109   : > { %v677_v63 = vpack.c.bf16 %v652_v61, %v651_v59  ;;  %v521_v0 = vadd.f32 %v1342_v62, %v1551_v53  ;;  %v512_v1 = vpop.f32.mrb[17].mxu0 }
 0x10a   : > { %v513_v2 = vadd.f32 %v1551_v53, %v512_v1  ;;  %v1343_v3 = vpop.f32.mrb[18].mxu0 }
 0x10b   : > { %v625_v4 = vmul.f32 0.01, %v521_v0  ;;  %v524_v5 = vadd.f32 %v1343_v3, %v1551_v53  ;;  %v515_v6 = vpop.f32.mrb[19].mxu0  ;;  %1376 = vmatprep.mubr.msk.bf16.mxu1 %vm726_vm5, %v677_v63  ;;  %vm593_vm2 = vcmp.gt.f32.partialorder %v521_v0, 0.0 }
 0x10c   : > { %v623_v7 = vmul.f32 0.01, %v513_v2  ;;  %v516_v8 = vadd.f32 %v1551_v53, %v515_v6  ;;  %1377 = vmatmul.mubr.msk.bf16.gmra.mrb[12].mxu1 %vm726_vm5, %v678_v60  ;;  %vm591_vm3 = vcmp.gt.f32.partialorder %v513_v2, 0.0 }
 0x10d   : > { %vm594_vm4 = vcmp.gt.f32.partialorder %v524_v5, 0.0  ;;  %v626_v9 = vmul.f32 0.01, %v524_v5  ;;  %v657_v11 = vsel %vm593_vm2, %v521_v0, %v625_v4 }
 0x10e   : > { %vm592_vm6 = vcmp.gt.f32.partialorder %v516_v8, 0.0  ;;  %v624_v10 = vmul.f32 0.01, %v516_v8  ;;  %v655_v13 = vsel %vm591_vm3, %v513_v2, %v623_v7  ;;  %vm1051_vm3 = vcmask 261120  }
 0x10f   : > { %v658_v12 = vsel %vm594_vm4, %v524_v5, %v626_v9 }
 0x110   : > { %v680_v14 = vpack.c.bf16 %v658_v12, %v657_v11  ;;  %v656_v15 = vsel %vm592_vm6, %v516_v8, %v624_v10  ;;  %v1346_v16 = vpop.f32.mrb[20].mxu0  ;;  %v1604_v8 = vld [vmem:[%s1748_s5] sm:$0x1] }
 0x111   : > { %v679_v17 = vpack.c.bf16 %v656_v15, %v655_v13  ;;  %v537_v18 = vadd.f32 %v1346_v16, %v1551_v53  ;;  %v528_v19 = vpop.f32.mrb[21].mxu0  ;;  %1320 = vmatprep.mubr.msk.bf16.mxu0 %vm1051_vm3, %v1604_v8 }
 0x112   : > { %v529_v20 = vadd.f32 %v1551_v53, %v528_v19  ;;  %v1347_v21 = vpop.f32.mrb[22].mxu0 }
 0x113   : > { %vm597_vm7 = vcmp.gt.f32.partialorder %v537_v18, 0.0  ;;  %v629_v22 = vmul.f32 0.01, %v537_v18  ;;  %v540_v23 = vadd.f32 %v1347_v21, %v1551_v53  ;;  %v531_v24 = vpop.f32.mrb[23].mxu0  ;;  %1380 = vmatprep.mubr.msk.bf16.mxu1 %vm726_vm5, %v679_v17 }
 0x114   : > { %vm595_vm8 = vcmp.gt.f32.partialorder %v529_v20, 0.0  ;;  %v627_v25 = vmul.f32 0.01, %v529_v20  ;;  %v532_v26 = vadd.f32 %v1551_v53, %v531_v24  ;;  %1381 = vmatmul.mubr.msk.bf16.gmra.mrb[16].mxu1 %vm726_vm5, %v680_v14 }
 0x115   : > { %v661_v27 = vsel %vm597_vm7, %v537_v18, %v629_v22  ;;  %vm598_vm9 = vcmp.gt.f32.partialorder %v540_v23, 0.0  ;;  %v630_v28 = vmul.f32 0.01, %v540_v23 }
 0x116   : > { %v659_v29 = vsel %vm595_vm8, %v529_v20, %v627_v25  ;;  %vm596_vm10 = vcmp.gt.f32.partialorder %v532_v26, 0.0  ;;  %v628_v30 = vmul.f32 0.01, %v532_v26 }
 0x117   : > { %v662_v31 = vsel %vm598_vm9, %v540_v23, %v630_v28 }
 0x118   : > { %v682_v32 = vpack.c.bf16 %v662_v31, %v661_v27  ;;  %v660_v33 = vsel %vm596_vm10, %v532_v26, %v628_v30  ;;  %v1350_v34 = vpop.f32.mrb[24].mxu0 }
 0x119   : > { %v681_v35 = vpack.c.bf16 %v660_v33, %v659_v29  ;;  %v553_v36 = vadd.f32 %v1350_v34, %v1551_v53  ;;  %v544_v37 = vpop.f32.mrb[25].mxu0 }
 0x11a   : > { %v545_v38 = vadd.f32 %v1551_v53, %v544_v37  ;;  %v1351_v39 = vpop.f32.mrb[26].mxu0 }
 0x11b   : > { %1384 = vmatprep.mubr.msk.bf16.mxu1 %vm726_vm5, %v681_v35  ;;  %vm601_vm11 = vcmp.gt.f32.partialorder %v553_v36, 0.0  ;;  %v633_v40 = vmul.f32 0.01, %v553_v36  ;;  %v556_v41 = vadd.f32 %v1351_v39, %v1551_v53  ;;  %v547_v42 = vpop.f32.mrb[27].mxu0 }
 0x11c   : > { %1385 = vmatmul.mubr.msk.bf16.gmra.mrb[20].mxu1 %vm726_vm5, %v682_v32  ;;  %vm599_vm12 = vcmp.gt.f32.partialorder %v545_v38, 0.0  ;;  %v631_v43 = vmul.f32 0.01, %v545_v38  ;;  %v548_v44 = vadd.f32 %v1551_v53, %v547_v42 }
 0x11d   : > { %v665_v45 = vsel %vm601_vm11, %v553_v36, %v633_v40  ;;  %vm602_vm13 = vcmp.gt.f32.partialorder %v556_v41, 0.0  ;;  %v634_v46 = vmul.f32 0.01, %v556_v41 }
 0x11e   : > { %v663_v47 = vsel %vm599_vm12, %v545_v38, %v631_v43  ;;  %vm600_vm14 = vcmp.gt.f32.partialorder %v548_v44, 0.0  ;;  %v632_v48 = vmul.f32 0.01, %v548_v44 }
 0x11f   : > { %v666_v49 = vsel %vm602_vm13, %v556_v41, %v634_v46 }
 0x120   : > { %v684_v50 = vpack.c.bf16 %v666_v49, %v665_v45  ;;  %v664_v51 = vsel %vm600_vm14, %v548_v44, %v632_v48  ;;  %v1354_v52 = vpop.f32.mrb[28].mxu0 }
 0x121   : > { %v683_v54 = vpack.c.bf16 %v664_v51, %v663_v47  ;;  %v569_v55 = vadd.f32 %v1354_v52, %v1551_v53  ;;  %v560_v56 = vpop.f32.mrb[29].mxu0 }
 0x122   : > { %v561_v57 = vadd.f32 %v1551_v53, %v560_v56  ;;  %v1355_v58 = vpop.f32.mrb[30].mxu0 }
 0x123   : > { %1388 = vmatprep.mubr.msk.bf16.mxu1 %vm726_vm5, %v683_v54  ;;  %vm605_vm15 = vcmp.gt.f32.partialorder %v569_v55, 0.0  ;;  %v637_v59 = vmul.f32 0.01, %v569_v55  ;;  %v572_v60 = vadd.f32 %v1355_v58, %v1551_v53  ;;  %v563_v61 = vpop.f32.mrb[31].mxu0 }
 0x124   : > { %1389 = vmatmul.mubr.msk.bf16.gmra.mrb[24].mxu1 %vm726_vm5, %v684_v50  ;;  %vm603_vm0 = vcmp.gt.f32.partialorder %v561_v57, 0.0  ;;  %v635_v62 = vmul.f32 0.01, %v561_v57  ;;  %v564_v63 = vadd.f32 %v1551_v53, %v563_v61  ;;  %v1611_v53 = vld [vmem:[%s1747_s4] ss:$0 sm:$0xff] }
 0x125   : > { %v669_v0 = vsel %vm605_vm15, %v569_v55, %v637_v59  ;;  %vm606_vm1 = vcmp.gt.f32.partialorder %v572_v60, 0.0  ;;  %v638_v1 = vmul.f32 0.01, %v572_v60 }
 0x126   : > { %v667_v2 = vsel %vm603_vm0, %v561_v57, %v635_v62  ;;  %vm604_vm2 = vcmp.gt.f32.partialorder %v564_v63, 0.0  ;;  %v636_v3 = vmul.f32 0.01, %v564_v63 }
 0x127   : > { %v670_v4 = vsel %vm606_vm1, %v572_v60, %v638_v1 }
 0x128   : > { %v686_v5 = vpack.c.bf16 %v670_v4, %v669_v0  ;;  %v668_v6 = vsel %vm604_vm2, %v564_v63, %v636_v3 }
 0x129   : > { %v685_v7 = vpack.c.bf16 %v668_v6, %v667_v2 }
 0x12b   : > { %1392 = vmatprep.mubr.msk.bf16.mxu1 %vm726_vm5, %v685_v7 }
 0x12c   : > { %1393 = vmatmul.mubr.msk.bf16.gmra.mrb[28].mxu1 %vm726_vm5, %v686_v5 }
 0x1c7   : > { %v1366_v9 = vpop.f32.mrb[0].mxu1 }
 0x1c8   : > { %v818_v10 = vadd.f32 %v1366_v9, %v1611_v53  ;;  %v809_v11 = vpop.f32.mrb[1].mxu1 }
 0x1c9   : > { %v810_v12 = vadd.f32 %v1611_v53, %v809_v11  ;;  %v1367_v13 = vpop.f32.mrb[2].mxu1 }
 0x1ca   : > { %v970_v14 = vmul.f32 0.01, %v818_v10  ;;  %v821_v15 = vadd.f32 %v1367_v13, %v1611_v53  ;;  %v812_v16 = vpop.f32.mrb[3].mxu1  ;;  %vm938_vm5 = vcmp.gt.f32.partialorder %v818_v10, 0.0 }
 0x1cb   : > { %v968_v17 = vmul.f32 0.01, %v810_v12  ;;  %v813_v18 = vadd.f32 %v1611_v53, %v812_v16  ;;  %vm936_vm4 = vcmp.gt.f32.partialorder %v810_v12, 0.0 }
 0x1cc   : > { %vm939_vm6 = vcmp.gt.f32.partialorder %v821_v15, 0.0  ;;  %v971_v19 = vmul.f32 0.01, %v821_v15  ;;  %v1617_v21 = vsel %vm938_vm5, %v818_v10, %v970_v14 }
 0x1cd   : > { %vm937_vm7 = vcmp.gt.f32.partialorder %v813_v18, 0.0  ;;  %v969_v20 = vmul.f32 0.01, %v813_v18  ;;  %v1621_v23 = vsel %vm936_vm4, %v810_v12, %v968_v17 }
 0x1ce   : > { %v1619_v22 = vsel %vm939_vm6, %v821_v15, %v971_v19 }
 0x1cf   : > { %v1623_v24 = vsel %vm937_vm7, %v813_v18, %v969_v20  ;;  %v1370_v25 = vpop.f32.mrb[4].mxu1  ;;  %v1034_v26 = vpack.c.bf16 %v1619_v22, %v1617_v21 }
 0x1d0   : > { %v834_v27 = vadd.f32 %v1370_v25, %v1611_v53  ;;  %v825_v28 = vpop.f32.mrb[5].mxu1  ;;  %v1033_v29 = vpack.c.bf16 %v1623_v24, %v1621_v23 }
 0x1d1   : > { %v826_v30 = vadd.f32 %v1611_v53, %v825_v28  ;;  %v1371_v31 = vpop.f32.mrb[6].mxu1 }
 0x1d2   : > { %v974_v32 = vmul.f32 0.01, %v834_v27  ;;  %v837_v33 = vadd.f32 %v1371_v31, %v1611_v53  ;;  %v828_v34 = vpop.f32.mrb[7].mxu1  ;;  %vm942_vm8 = vcmp.gt.f32.partialorder %v834_v27, 0.0 }
 0x1d3   : > { %v972_v35 = vmul.f32 0.01, %v826_v30  ;;  %v829_v36 = vadd.f32 %v1611_v53, %v828_v34  ;;  %vm940_vm9 = vcmp.gt.f32.partialorder %v826_v30, 0.0 }
 0x1d4   : > { %vm943_vm10 = vcmp.gt.f32.partialorder %v837_v33, 0.0  ;;  %v975_v37 = vmul.f32 0.01, %v837_v33  ;;  %v1633_v39 = vsel %vm942_vm8, %v834_v27, %v974_v32 }
 0x1d5   : > { %vm941_vm11 = vcmp.gt.f32.partialorder %v829_v36, 0.0  ;;  %v973_v38 = vmul.f32 0.01, %v829_v36  ;;  %v1637_v41 = vsel %vm940_vm9, %v826_v30, %v972_v35 }
 0x1d6   : > { %v1635_v40 = vsel %vm943_vm10, %v837_v33, %v975_v37 }
 0x1d7   : > { %v1639_v42 = vsel %vm941_vm11, %v829_v36, %v973_v38  ;;  %v1374_v43 = vpop.f32.mrb[8].mxu1  ;;  %v1036_v44 = vpack.c.bf16 %v1635_v40, %v1633_v39 }
 0x1d8   : > { %v850_v45 = vadd.f32 %v1374_v43, %v1611_v53  ;;  %v841_v46 = vpop.f32.mrb[9].mxu1  ;;  %v1035_v47 = vpack.c.bf16 %v1639_v42, %v1637_v41 }
 0x1d9   : > { %v842_v48 = vadd.f32 %v1611_v53, %v841_v46  ;;  %v1375_v49 = vpop.f32.mrb[10].mxu1 }
 0x1da   : > { %v978_v50 = vmul.f32 0.01, %v850_v45  ;;  %v853_v51 = vadd.f32 %v1375_v49, %v1611_v53  ;;  %v844_v52 = vpop.f32.mrb[11].mxu1  ;;  %vm946_vm12 = vcmp.gt.f32.partialorder %v850_v45, 0.0 }
 0x1db   : > { %v976_v54 = vmul.f32 0.01, %v842_v48  ;;  %v845_v55 = vadd.f32 %v1611_v53, %v844_v52  ;;  %vm944_vm13 = vcmp.gt.f32.partialorder %v842_v48, 0.0 }
 0x1dc   : > { %vm947_vm14 = vcmp.gt.f32.partialorder %v853_v51, 0.0  ;;  %v979_v56 = vmul.f32 0.01, %v853_v51  ;;  %v1649_v58 = vsel %vm946_vm12, %v850_v45, %v978_v50 }
 0x1dd   : > { %vm945_vm15 = vcmp.gt.f32.partialorder %v845_v55, 0.0  ;;  %v977_v57 = vmul.f32 0.01, %v845_v55  ;;  %v1653_v60 = vsel %vm944_vm13, %v842_v48, %v976_v54 }
 0x1de   : > { %v1651_v59 = vsel %vm947_vm14, %v853_v51, %v979_v56 }
 0x1df   : > { %v1655_v61 = vsel %vm945_vm15, %v845_v55, %v977_v57  ;;  %v1378_v62 = vpop.f32.mrb[12].mxu1  ;;  %v1038_v63 = vpack.c.bf16 %v1651_v59, %v1649_v58  ;;  %v1150_v59 = vlaneseq }
 0x1e0   : > { %v866_v0 = vadd.f32 %v1378_v62, %v1611_v53  ;;  %v857_v1 = vpop.f32.mrb[13].mxu1  ;;  %v1037_v2 = vpack.c.bf16 %v1655_v61, %v1653_v60  ;;  %v1056_v62 = vsel %vm1051_vm3, %v1033_v29, 0  ;;  %v1050_v60 = vstv %s1049_s25 }
 0x1e1   : > { %v858_v3 = vadd.f32 %v1611_v53, %v857_v1  ;;  %v1379_v4 = vpop.f32.mrb[14].mxu1 }
 0x1e2   : > { %v982_v5 = vmul.f32 0.01, %v866_v0  ;;  %v869_v6 = vadd.f32 %v1379_v4, %v1611_v53  ;;  %v860_v7 = vpop.f32.mrb[15].mxu1  ;;  %vm950_vm0 = vcmp.gt.f32.partialorder %v866_v0, 0.0 }
 0x1e3   : > { %v980_v9 = vmul.f32 0.01, %v858_v3  ;;  %v861_v10 = vadd.f32 %v1611_v53, %v860_v7  ;;  %vm948_vm1 = vcmp.gt.f32.partialorder %v858_v3, 0.0 }
 0x1e4   : > { %vm951_vm2 = vcmp.gt.f32.partialorder %v869_v6, 0.0  ;;  %v983_v11 = vmul.f32 0.01, %v869_v6  ;;  %v1665_v13 = vsel %vm950_vm0, %v866_v0, %v982_v5 }
 0x1e5   : > { %vm949_vm5 = vcmp.gt.f32.partialorder %v861_v10, 0.0  ;;  %v981_v12 = vmul.f32 0.01, %v861_v10  ;;  %v1669_v15 = vsel %vm948_vm1, %v858_v3, %v980_v9 }
 0x1e6   : > { %v1667_v14 = vsel %vm951_vm2, %v869_v6, %v983_v11 }
 0x1e7   : > { %v1671_v16 = vsel %vm949_vm5, %v861_v10, %v981_v12  ;;  %v1382_v17 = vpop.f32.mrb[16].mxu1  ;;  %v1040_v18 = vpack.c.bf16 %v1667_v14, %v1665_v13 }
 0x1e8   : > { %v882_v19 = vadd.f32 %v1382_v17, %v1611_v53  ;;  %v873_v20 = vpop.f32.mrb[17].mxu1  ;;  %v1039_v25 = vpack.c.bf16 %v1671_v16, %v1669_v15 }
 0x1e9   : > { %v874_v27 = vadd.f32 %v1611_v53, %v873_v20  ;;  %v1383_v28 = vpop.f32.mrb[18].mxu1  ;;  %v1077_v40 = vsel %vm1051_vm3, %v1040_v18, 0 }
 0x1ea   : > { %v986_v30 = vmul.f32 0.01, %v882_v19  ;;  %v885_v31 = vadd.f32 %v1383_v28, %v1611_v53  ;;  %v876_v32 = vpop.f32.mrb[19].mxu1  ;;  %vm954_vm4 = vcmp.gt.f32.partialorder %v882_v19, 0.0  ;;  %v1074_v39 = vsel %vm1051_vm3, %v1039_v25, 0 }
 0x1eb   : > { %v984_v33 = vmul.f32 0.01, %v874_v27  ;;  %v877_v34 = vadd.f32 %v1611_v53, %v876_v32  ;;  %vm952_vm6 = vcmp.gt.f32.partialorder %v874_v27, 0.0 }
 0x1ec   : > { %vm955_vm7 = vcmp.gt.f32.partialorder %v885_v31, 0.0  ;;  %v987_v35 = vmul.f32 0.01, %v885_v31  ;;  %v1018_v37 = vsel %vm954_vm4, %v882_v19, %v986_v30  ;;  %v1059_v19 = vsel %vm1051_vm3, %v1034_v26, 0 }
 0x1ed   : > { %vm953_vm8 = vcmp.gt.f32.partialorder %v877_v34, 0.0  ;;  %v985_v36 = vmul.f32 0.01, %v877_v34  ;;  %v1016_v43 = vsel %vm952_vm6, %v874_v27, %v984_v33 }
 0x1ee   : > { %v1019_v38 = vsel %vm955_vm7, %v885_v31, %v987_v35 }
 0x1ef   : > { %v1042_v45 = vpack.c.bf16 %v1019_v38, %v1018_v37  ;;  %v1017_v46 = vsel %vm953_vm8, %v877_v34, %v985_v36  ;;  %v1386_v48 = vpop.f32.mrb[20].mxu1 }
 0x1f0   : > { %v1041_v49 = vpack.c.bf16 %v1017_v46, %v1016_v43  ;;  %v898_v50 = vadd.f32 %v1386_v48, %v1611_v53  ;;  %v889_v51 = vpop.f32.mrb[21].mxu1  ;;  %v1062_v48 = vsel %vm1051_vm3, %v1035_v47, 0 }
 0x1f1   : > { %v890_v52 = vadd.f32 %v1611_v53, %v889_v51  ;;  %v1387_v54 = vpop.f32.mrb[22].mxu1 }
 0x1f2   : > { %v990_v55 = vmul.f32 0.01, %v898_v50  ;;  %v901_v56 = vadd.f32 %v1387_v54, %v1611_v53  ;;  %v892_v57 = vpop.f32.mrb[23].mxu1  ;;  %1396 = vmatprep.subr.msk.bf16.mxu0 %vm1051_vm3, %v1041_v49  ;;  %vm958_vm9 = vcmp.gt.f32.partialorder %v898_v50, 0.0 }
 0x1f3   : > { %v988_v0 = vmul.f32 0.01, %v890_v52  ;;  %v893_v1 = vadd.f32 %v1611_v53, %v892_v57  ;;  %1305 = vmatpush3.bf16.xpose.msra.mxu0 %v1056_v62  ;;  %vm956_vm10 = vcmp.gt.f32.partialorder %v890_v52, 0.0 }
 0x1f4   : > { %vm959_vm11 = vcmp.gt.f32.partialorder %v901_v56, 0.0  ;;  %v991_v3 = vmul.f32 0.01, %v901_v56  ;;  %1397 = vmatprep.subr.msk.bf16.mxu0 %vm1051_vm3, %v1042_v45  ;;  %v1022_v5 = vsel %vm958_vm9, %v898_v50, %v990_v55 }
 0x1f5   : > { %vm957_vm12 = vcmp.gt.f32.partialorder %v893_v1, 0.0  ;;  %v989_v4 = vmul.f32 0.01, %v893_v1  ;;  %v1020_v7 = vsel %vm956_vm10, %v890_v52, %v988_v0 }
 0x1f6   : > { %v1023_v6 = vsel %vm959_vm11, %v901_v56, %v991_v3  ;;  %v1071_v3 = vsel %vm1051_vm3, %v1038_v63, 0  ;;  %v1151_v63 = vshrl.u32 %v1150_v59, 7 }
 0x1f7   : > { %v1044_v9 = vpack.c.bf16 %v1023_v6, %v1022_v5  ;;  %v1021_v10 = vsel %vm957_vm12, %v893_v1, %v989_v4  ;;  %v1390_v23 = vpop.f32.mrb[24].mxu1  ;;  %v1065_v1 = vsel %vm1051_vm3, %v1036_v44, 0  ;;  %v1426_v44 = vmov 1966171168  }
 0x1f8   : > { %v1043_v24 = vpack.c.bf16 %v1021_v10, %v1020_v7  ;;  %v914_v29 = vadd.f32 %v1390_v23, %v1611_v53  ;;  %v905_v11 = vpop.f32.mrb[25].mxu1  ;;  %v1148_v58 = vunpack.c.l.s4 %v1426_v44 }
 0x1f9   : > { %v906_v12 = vadd.f32 %v1611_v53, %v905_v11  ;;  %v1391_v17 = vpop.f32.mrb[26].mxu1 }
 0x1fa   : > { %vm962_vm13 = vcmp.gt.f32.partialorder %v914_v29, 0.0  ;;  %v994_v20 = vmul.f32 0.01, %v914_v29  ;;  %v917_v27 = vadd.f32 %v1391_v17, %v1611_v53  ;;  %v908_v28 = vpop.f32.mrb[27].mxu1  ;;  %v1149_v61 = vunpack.c.0.s8 %v1148_v58 }
 0x1fb   : > { %1307 = vmatpush3.bf16.xpose.msra.mxu0 %v1059_v19  ;;  %vm960_vm14 = vcmp.gt.f32.partialorder %v906_v12, 0.0  ;;  %v992_v30 = vmul.f32 0.01, %v906_v12  ;;  %v909_v31 = vadd.f32 %v1611_v53, %v908_v28 }
 0x1fc   : > { %v1026_v32 = vsel %vm962_vm13, %v914_v29, %v994_v20  ;;  %1398 = vmatprep.subr.msk.bf16.mxu0 %vm1051_vm3, %v1043_v24  ;;  %vm963_vm15 = vcmp.gt.f32.partialorder %v917_v27, 0.0  ;;  %v995_v33 = vmul.f32 0.01, %v917_v27  ;;  %v1152_v14 = vsub.s32 %v1149_v61, %v1151_v63 }
 0x1fd   : > { %v1024_v34 = vsel %vm960_vm14, %v906_v12, %v992_v30  ;;  %vm961_vm0 = vcmp.gt.f32.partialorder %v909_v31, 0.0  ;;  %v993_v21 = vmul.f32 0.01, %v909_v31 }
 0x1fe   : > { %v1027_v22 = vsel %vm963_vm15, %v917_v27, %v995_v33 }
 0x1ff   : > { %v1046_v26 = vpack.c.bf16 %v1027_v22, %v1026_v32  ;;  %v1025_v35 = vsel %vm961_vm0, %v909_v31, %v993_v21  ;;  %v1394_v36 = vpop.f32.mrb[28].mxu1 }
 0x200   : > { %v1045_v37 = vpack.c.bf16 %v1025_v35, %v1024_v34  ;;  %v930_v38 = vadd.f32 %v1394_v36, %v1611_v53  ;;  %v921_v43 = vpop.f32.mrb[29].mxu1 }
 0x201   : > { %v922_v45 = vadd.f32 %v1611_v53, %v921_v43  ;;  %v1395_v46 = vpop.f32.mrb[30].mxu1 }
 0x202   : > { %vm966_vm1 = vcmp.gt.f32.partialorder %v930_v38, 0.0  ;;  %v998_v49 = vmul.f32 0.01, %v930_v38  ;;  %v933_v50 = vadd.f32 %v1395_v46, %v1611_v53  ;;  %v924_v51 = vpop.f32.mrb[31].mxu1 }
 0x203   : > { %1309 = vmatpush3.bf16.xpose.msra.mxu0 %v1062_v48  ;;  %vm964_vm2 = vcmp.gt.f32.partialorder %v922_v45, 0.0  ;;  %v996_v52 = vmul.f32 0.01, %v922_v45  ;;  %v925_v54 = vadd.f32 %v1611_v53, %v924_v51  ;;  %v1068_v53 = vsel %vm1051_vm3, %v1037_v2, 0 }
 0x204   : > { %1399 = vmatprep.subr.msk.bf16.mxu0 %vm1051_vm3, %v1044_v9  ;;  %v1030_v55 = vsel %vm966_vm1, %v930_v38, %v998_v49  ;;  %vm967_vm5 = vcmp.gt.f32.partialorder %v933_v50, 0.0  ;;  %v999_v56 = vmul.f32 0.01, %v933_v50 }
 0x205   : > { %v1028_v57 = vsel %vm964_vm2, %v922_v45, %v996_v52  ;;  %vm965_vm4 = vcmp.gt.f32.partialorder %v925_v54, 0.0  ;;  %v997_v41 = vmul.f32 0.01, %v925_v54 }
 0x206   : > { %v1031_v42 = vsel %vm967_vm5, %v933_v50, %v999_v56 }
 0x207   : > { %v1048_v47 = vpack.c.bf16 %v1031_v42, %v1030_v55  ;;  %v1029_v62 = vsel %vm965_vm4, %v925_v54, %v997_v41 }
 0x208   : > { %v1047_v0 = vpack.c.bf16 %v1029_v62, %v1028_v57 }
 0x20b   : > { %1311 = vmatpush3.bf16.xpose.msra.mxu0 %v1065_v1 }
 0x20c   : > { %1400 = vmatprep.subr.msk.bf16.mxu0 %vm1051_vm3, %v1045_v37 }
 0x213   : > { %1313 = vmatpush3.bf16.xpose.msra.mxu0 %v1068_v53 }
 0x214   : > { %1401 = vmatprep.subr.msk.bf16.mxu0 %vm1051_vm3, %v1046_v26 }
 0x21b   : > { %1315 = vmatpush3.bf16.xpose.msra.mxu0 %v1071_v3 }
 0x21c   : > { %1402 = vmatprep.subr.msk.bf16.mxu0 %vm1051_vm3, %v1047_v0 }
 0x223   : > { %1317 = vmatpush3.bf16.xpose.msra.mxu0 %v1074_v39 }
 0x224   : > { %1403 = vmatprep.subr.msk.bf16.mxu0 %vm1051_vm3, %v1048_v47 }
 0x22b   : > { %1319 = vmatpush3.bf16.xpose.msra.mxu0 %v1077_v40 }
 0x232   : > { %1321 = vmatmul.mubr.msk.bf16.vlgmr.msra.gmra.mrb[32].mxu0 %vm1051_vm3, %v1604_v8  ;;  %vm1164_vm3 = vcmp.lt.s32.totalorder %v1150_v59, 256 }
 0x305   : > { %v1137_v2 = vpop.f32.mrb[32].mxu0 }
 0x306   : > { %v1138_v15 = vadd.f32 %v1137_v2, %v1050_v60  ;;  %v1139_v16 = vpop.f32.mrb[33].mxu0 }
 0x307   : > { %v1140_v13 = vadd.f32 %v1139_v16, %v1050_v60  ;;  %v1141_v18 = vpop.f32.mrb[34].mxu0 }
 0x308   : > { %v1142_v25 = vpop.f32.mrb[35].mxu0 }
 0x309   : > { %v1146_v4 = vcombine.low %v1138_v15, %v1140_v13 }
 0x30b   : > { %v1153_v8 = vrot.slane %v1146_v4, %v1152_v14 }
 0x30d   : > { %v1160_v5 = vrot.slane %v1153_v8, %v1152_v14 }
 0x30f   : > { %1166 = vst.msk [vmem:[%s299_s30] sm:$0x3] %vm1164_vm3, %v1160_v5 }
 0x310 PF: > { %s18_s26 = sadd.s32 1, %s1424_s26  }
 0x311   : > { %p15_p5 = scmp.ge.s32.totalorder %s18_s26, 6  }
 0x313   :  { %17 = sbr.rel (!%p15_p5) target bundleno = 2 (0x2), region = 78 }

</bundles_post_ra>
